<compile_context>
chip_gen: v6e
topology: v6e:2x2x1
jax: 0.10.0
libtpu: 0.0.40
codegen_flags: <defaults>
</compile_context>

<pallas_src>
import functools
import math

import jax
import jax.numpy as jnp
from jax.experimental import pallas as pl
from jax.experimental.pallas import tpu as pltpu

_LOG_SQRT_2PI = 0.5 * math.log(2.0 * math.pi)


def _normal_logprob(x, loc, scale):
    # torch.distributions.Normal.log_prob (used only by the pure-JAX reference):
    #   -((x-loc)^2) / (2*scale^2) - log(scale) - log(sqrt(2*pi))
    return -0.5 * ((x - loc) / scale) ** 2 - jnp.log(scale) - _LOG_SQRT_2PI


def goal_q_kernel(inv_goal, inv_damp, inv_act_sq, const_total,
                  state_ref, action_ref, noise_ref, goal_ref,
                  w1s_ref, w1a_ref, b1_ref, w2_ref, b2_ref,
                  wloc_ref, bloc_ref, wscale_ref, bscale_ref,
                  reward_ref):
    state = state_ref[...]                       # [TB, S]  (== prev_state)
    act = jnp.tanh(action_ref[...])              # agent.postprocess_action == True

    # ---- state likelihood model: 2-layer tanh MLP on (state, action) ----
    h = jnp.tanh(
        jnp.dot(state, w1s_ref[...], preferred_element_type=jnp.float32)
        + jnp.dot(act, w1a_ref[...], preferred_element_type=jnp.float32)
        + b1_ref[...])
    h = jnp.tanh(
        jnp.dot(h, w2_ref[...], preferred_element_type=jnp.float32) + b2_ref[...])

    # ---- state variable: Normal(loc, scale); residual reparameterized sample ----
    loc = jnp.dot(h, wloc_ref[...], preferred_element_type=jnp.float32) + bloc_ref[...]
    log_scale = (jnp.dot(h, wscale_ref[...], preferred_element_type=jnp.float32)
                 + bscale_ref[...])
    next_state = state + loc + jnp.exp(log_scale) * noise_ref[...]   # sample()

    S = state.shape[1]
    first8 = jax.lax.broadcasted_iota(jnp.int32, (1, S), 1) < 8      # [1, S]

    # Constant per-feature inverse scales (no log / reciprocal in-kernel).
    inv_goal_vec = jnp.where(first8, inv_goal, 1.0).astype(jnp.float32)
    inv_damp_vec = jnp.where(first8, inv_damp, 1.0).astype(jnp.float32)

    # goal reward quadratic term: Normal(goal_loc, goal_scale).log_prob(next_state)
    goal_err = (next_state - goal_ref[...]) * inv_goal_vec
    # damping reward quadratic term: loc = prev_state with dims [8:] zeroed
    damp_err = (next_state - jnp.where(first8, state, 0.0)) * inv_damp_vec

    # Fused elementwise sum -> a single cross-lane reduction for goal + damping.
    quad_sd = jnp.sum(goal_err * goal_err + damp_err * damp_err,
                      axis=1, keepdims=True)
    # action reward quadratic term: Normal(0, action_scale).log_prob(tanh(action))
    quad_a = jnp.sum(act * act, axis=1, keepdims=True)

    # All "-log(scale) - log(sqrt(2*pi))" terms are folded into const_total.
    reward_ref[...] = -0.5 * (quad_sd + inv_act_sq * quad_a) + const_total


def _pick_batch_tile(B, batch_size, n_action_samples, cap=1024):
    """Largest TB <= cap with TB | B, batch_size | TB (goal-repeat alignment) and
    TB % 8 == 0 (sublane tiling) -- otherwise fall back to the whole batch."""
    best = None
    for k in range(1, n_action_samples + 1):
        if n_action_samples % k:
            continue
        tb = batch_size * k
        if tb > cap:
            continue
        if tb % 8 != 0 and tb != B:
            continue
        if best is None or tb > best:
            best = tb
    return best if best is not None else B


def goal_based_q_estimate(state, action, noise, goal_state, params,
                          n_action_samples, goal_std=1.0, action_scale=0.1,
                          tile_cap=1024):
    """state/action/noise: [B, *] with B = batch_size * n_action_samples.
    goal_state: [batch_size, S].  Returns reward [B, 1] (float32)."""
    B, S = state.shape
    A = action.shape[1]
    batch_size = goal_state.shape[0]
    assert B == batch_size * n_action_samples

    TB = _pick_batch_tile(B, batch_size, n_action_samples, tile_cap)
    grid = (B // TB,)

    # Goal tile: only TB rows (not B).  Valid because TB % batch_size == 0, so the
    # torch `goal_state.repeat(n_action_samples, 1)` pattern is identical inside
    # every batch tile; it stays VMEM-resident (block index constant across steps).
    goal_tile = jnp.tile(goal_state.astype(jnp.float32), (TB // batch_size, 1))

    # Compile-time constants of the Normal log-probs (hoisted out of the kernel).
    n8 = min(8, S)
    inv_goal = 1.0 / float(goal_std)
    inv_damp = 1.0 / (10.0 * float(goal_std))
    inv_act_sq = 1.0 / float(action_scale) ** 2
    const_total = (-(n8 * math.log(float(goal_std))
                     + n8 * math.log(10.0 * float(goal_std))
                     + A * math.log(float(action_scale)))
                   - (2 * S + A) * _LOG_SQRT_2PI)

    def row(d):                                   # streamed over the batch axis
        return pl.BlockSpec((TB, d), lambda i: (i, 0))

    def res(x):                                   # resident (constant block index)
        return pl.BlockSpec(x.shape, lambda i, n=x.ndim: (0,) * n)

    inputs = (state, action, noise, goal_tile,
              params["w1s"], params["w1a"], params["b1"],
              params["w2"], params["b2"],
              params["wloc"], params["bloc"],
              params["wscale"], params["bscale"])
    in_specs = ([row(S), row(A), row(S), res(goal_tile)]
                + [res(w) for w in inputs[4:]])

    kernel = functools.partial(goal_q_kernel, inv_goal, inv_damp,
                               inv_act_sq, const_total)
    return pl.pallas_call(
        kernel,
        out_shape=jax.ShapeDtypeStruct((B, 1), jnp.float32),
        grid=grid,
        in_specs=in_specs,
        out_specs=pl.BlockSpec((TB, 1), lambda i: (i, 0)),
        compiler_params=pltpu.CompilerParams(
            dimension_semantics=("parallel",)),
    )(*inputs)


def _reference(state, action, noise, goal_state, params,
               n_action_samples, goal_std=1.0, action_scale=0.1):
    """Pure-JAX reference of the same forward math (unhoisted, direct form)."""
    act = jnp.tanh(action)
    h = jnp.tanh(state @ params["w1s"] + act @ params["w1a"] + params["b1"])
    h = jnp.tanh(h @ params["w2"] + params["b2"])
    loc = h @ params["wloc"] + params["bloc"]
    scale = jnp.exp(h @ params["wscale"] + params["bscale"])
    next_state = state + loc + scale * noise

    B, S = state.shape
    first8 = jnp.arange(S)[None, :] < 8
    goal_loc = jnp.tile(goal_state, (n_action_samples, 1))
    goal_scale = jnp.where(first8, goal_std, 1.0)
    goal_r = _normal_logprob(next_state, goal_loc, goal_scale).sum(1, keepdims=True)
    prev_loc = jnp.where(first8, state, 0.0)
    prev_scale = jnp.where(first8, goal_std * 10.0, 1.0)
    damp_r = _normal_logprob(next_state, prev_loc, prev_scale).sum(1, keepdims=True)
    act_r = _normal_logprob(act, 0.0, action_scale).sum(1, keepdims=True)
    return goal_r + damp_r + act_r


def _init_params(key, state_dim, action_dim, hidden):
    ks = jax.random.split(key, 8)
    s = 0.1
    return {
        "w1s": s * jax.random.normal(ks[0], (state_dim, hidden), jnp.float32),
        "w1a": s * jax.random.normal(ks[1], (action_dim, hidden), jnp.float32),
        "b1": jnp.zeros((1, hidden), jnp.float32),
        "w2": s * jax.random.normal(ks[2], (hidden, hidden), jnp.float32),
        "b2": jnp.zeros((1, hidden), jnp.float32),
        "wloc": s * jax.random.normal(ks[3], (hidden, state_dim), jnp.float32),
        "bloc": jnp.zeros((1, state_dim), jnp.float32),
        "wscale": s * jax.random.normal(ks[4], (hidden, state_dim), jnp.float32),
        "bscale": -1.0 * jnp.ones((1, state_dim), jnp.float32),
    }


if __name__ == "__main__":
    batch_size = 2
    n_action_samples = 4
    B = batch_size * n_action_samples          # 8
    state_dim = 16                              # >= 8 (first-8-dims goal convention)
    action_dim = 8
    hidden = 32
    goal_std = 1.0
    action_scale = 0.1

    key = jax.random.PRNGKey(0)
    k_state, k_action, k_noise, k_goal, k_params = jax.random.split(key, 5)

    state = jax.random.normal(k_state, (B, state_dim), jnp.float32)
    action = jax.random.normal(k_action, (B, action_dim), jnp.float32)
    noise = jax.random.normal(k_noise, (B, state_dim), jnp.float32)
    goal_state = jax.random.normal(k_goal, (batch_size, state_dim), jnp.float32)
    params = _init_params(k_params, state_dim, action_dim, hidden)

    reward = goal_based_q_estimate(state, action, noise, goal_state, params,
                                   n_action_samples, goal_std, action_scale)
    reward = jax.block_until_ready(reward)

    ref = _reference(state, action, noise, goal_state, params,
                     n_action_samples, goal_std, action_scale)
    assert reward.shape == (B, 1)
    assert jnp.all(jnp.isfinite(reward))
    assert jnp.allclose(reward, ref, atol=1e-4, rtol=1e-4)
    print("KERNEL_OK")
</pallas_src>

<mosaic_0001>
module attributes {stable_mosaic.version = 11 : i64} {
  func.func @goal_q_kernel(%arg0: i32, %arg1: memref<8x16xf32, #tpu.memory_space<vmem>>, %arg2: memref<8x8xf32, #tpu.memory_space<vmem>>, %arg3: memref<8x16xf32, #tpu.memory_space<vmem>>, %arg4: memref<8x16xf32, #tpu.memory_space<vmem>>, %arg5: memref<16x32xf32, #tpu.memory_space<vmem>>, %arg6: memref<8x32xf32, #tpu.memory_space<vmem>>, %arg7: memref<1x32xf32, #tpu.memory_space<vmem>>, %arg8: memref<32x32xf32, #tpu.memory_space<vmem>>, %arg9: memref<1x32xf32, #tpu.memory_space<vmem>>, %arg10: memref<32x16xf32, #tpu.memory_space<vmem>>, %arg11: memref<1x16xf32, #tpu.memory_space<vmem>>, %arg12: memref<32x16xf32, #tpu.memory_space<vmem>>, %arg13: memref<1x16xf32, #tpu.memory_space<vmem>>, %arg14: memref<8x1xf32, #tpu.memory_space<vmem>>) attributes {dimension_semantics = [#tpu.dimension_semantics<parallel>], iteration_bounds = array<i64: 1>, scalar_prefetch = 0 : i64, scratch_operands = 0 : i64, tpu.core_type = #tpu.core_type<tc>, window_params = [{transform_indices = @transform_0, window_bounds = array<i64: 8, 16>}, {transform_indices = @transform_1, window_bounds = array<i64: 8, 8>}, {transform_indices = @transform_2, window_bounds = array<i64: 8, 16>}, {pipeline_mode = #tpu.pipeline_mode<synchronous>, transform_indices = @transform_3, window_bounds = array<i64: 8, 16>}, {pipeline_mode = #tpu.pipeline_mode<synchronous>, transform_indices = @transform_4, window_bounds = array<i64: 16, 32>}, {pipeline_mode = #tpu.pipeline_mode<synchronous>, transform_indices = @transform_5, window_bounds = array<i64: 8, 32>}, {pipeline_mode = #tpu.pipeline_mode<synchronous>, transform_indices = @transform_6, window_bounds = array<i64: 1, 32>}, {pipeline_mode = #tpu.pipeline_mode<synchronous>, transform_indices = @transform_7, window_bounds = array<i64: 32, 32>}, {pipeline_mode = #tpu.pipeline_mode<synchronous>, transform_indices = @transform_8, window_bounds = array<i64: 1, 32>}, {pipeline_mode = #tpu.pipeline_mode<synchronous>, transform_indices = @transform_9, window_bounds = array<i64: 32, 16>}, {pipeline_mode = #tpu.pipeline_mode<synchronous>, transform_indices = @transform_10, window_bounds = array<i64: 1, 16>}, {pipeline_mode = #tpu.pipeline_mode<synchronous>, transform_indices = @transform_11, window_bounds = array<i64: 32, 16>}, {pipeline_mode = #tpu.pipeline_mode<synchronous>, transform_indices = @transform_12, window_bounds = array<i64: 1, 16>}, {transform_indices = @transform_13, window_bounds = array<i64: 8, 1>}]} {
    %c0 = arith.constant 0 : index
    %c0_0 = arith.constant 0 : index
    %0 = vector.load %arg1[%c0, %c0_0] : memref<8x16xf32, #tpu.memory_space<vmem>>, vector<8x16xf32>
    %c0_1 = arith.constant 0 : index
    %c0_2 = arith.constant 0 : index
    %1 = vector.load %arg2[%c0_1, %c0_2] : memref<8x8xf32, #tpu.memory_space<vmem>>, vector<8x8xf32>
    %2 = math.tanh %1 : vector<8x8xf32>
    %c0_3 = arith.constant 0 : index
    %c0_4 = arith.constant 0 : index
    %3 = vector.load %arg5[%c0_3, %c0_4] : memref<16x32xf32, #tpu.memory_space<vmem>>, vector<16x32xf32>
    %cst = arith.constant dense<0.000000e+00> : vector<8x32xf32>
    %4 = tpu.matmul %0, %3, %cst {dimension_numbers = #tpu.dot_dimension_numbers<[1], [0], [0], [1], [0, 0, 1, 1], [], []>} : vector<8x16xf32>, vector<16x32xf32>, vector<8x32xf32> -> vector<8x32xf32>
    %c0_5 = arith.constant 0 : index
    %c0_6 = arith.constant 0 : index
    %5 = vector.load %arg6[%c0_5, %c0_6] : memref<8x32xf32, #tpu.memory_space<vmem>>, vector<8x32xf32>
    %cst_7 = arith.constant dense<0.000000e+00> : vector<8x32xf32>
    %6 = tpu.matmul %2, %5, %cst_7 {dimension_numbers = #tpu.dot_dimension_numbers<[1], [0], [0], [1], [0, 0, 1, 1], [], []>} : vector<8x8xf32>, vector<8x32xf32>, vector<8x32xf32> -> vector<8x32xf32>
    %7 = arith.addf %4, %6 : vector<8x32xf32>
    %c0_8 = arith.constant 0 : index
    %c0_9 = arith.constant 0 : index
    %8 = vector.load %arg7[%c0_8, %c0_9] : memref<1x32xf32, #tpu.memory_space<vmem>>, vector<1x32xf32>
    %9 = vector.broadcast %8 : vector<1x32xf32> to vector<8x32xf32>
    %10 = arith.addf %7, %9 : vector<8x32xf32>
    %11 = math.tanh %10 : vector<8x32xf32>
    %c0_10 = arith.constant 0 : index
    %c0_11 = arith.constant 0 : index
    %12 = vector.load %arg8[%c0_10, %c0_11] : memref<32x32xf32, #tpu.memory_space<vmem>>, vector<32x32xf32>
    %cst_12 = arith.constant dense<0.000000e+00> : vector<8x32xf32>
    %13 = tpu.matmul %11, %12, %cst_12 {dimension_numbers = #tpu.dot_dimension_numbers<[1], [0], [0], [1], [0, 0, 1, 1], [], []>} : vector<8x32xf32>, vector<32x32xf32>, vector<8x32xf32> -> vector<8x32xf32>
    %c0_13 = arith.constant 0 : index
    %c0_14 = arith.constant 0 : index
    %14 = vector.load %arg9[%c0_13, %c0_14] : memref<1x32xf32, #tpu.memory_space<vmem>>, vector<1x32xf32>
    %15 = vector.broadcast %14 : vector<1x32xf32> to vector<8x32xf32>
    %16 = arith.addf %13, %15 : vector<8x32xf32>
    %17 = math.tanh %16 : vector<8x32xf32>
    %c0_15 = arith.constant 0 : index
    %c0_16 = arith.constant 0 : index
    %18 = vector.load %arg10[%c0_15, %c0_16] : memref<32x16xf32, #tpu.memory_space<vmem>>, vector<32x16xf32>
    %cst_17 = arith.constant dense<0.000000e+00> : vector<8x16xf32>
    %19 = tpu.matmul %17, %18, %cst_17 {dimension_numbers = #tpu.dot_dimension_numbers<[1], [0], [0], [1], [0, 0, 1, 1], [], []>} : vector<8x32xf32>, vector<32x16xf32>, vector<8x16xf32> -> vector<8x16xf32>
    %c0_18 = arith.constant 0 : index
    %c0_19 = arith.constant 0 : index
    %20 = vector.load %arg11[%c0_18, %c0_19] : memref<1x16xf32, #tpu.memory_space<vmem>>, vector<1x16xf32>
    %21 = vector.broadcast %20 : vector<1x16xf32> to vector<8x16xf32>
    %22 = arith.addf %19, %21 : vector<8x16xf32>
    %c0_20 = arith.constant 0 : index
    %c0_21 = arith.constant 0 : index
    %23 = vector.load %arg12[%c0_20, %c0_21] : memref<32x16xf32, #tpu.memory_space<vmem>>, vector<32x16xf32>
    %cst_22 = arith.constant dense<0.000000e+00> : vector<8x16xf32>
    %24 = tpu.matmul %17, %23, %cst_22 {dimension_numbers = #tpu.dot_dimension_numbers<[1], [0], [0], [1], [0, 0, 1, 1], [], []>} : vector<8x32xf32>, vector<32x16xf32>, vector<8x16xf32> -> vector<8x16xf32>
    %c0_23 = arith.constant 0 : index
    %c0_24 = arith.constant 0 : index
    %25 = vector.load %arg13[%c0_23, %c0_24] : memref<1x16xf32, #tpu.memory_space<vmem>>, vector<1x16xf32>
    %26 = vector.broadcast %25 : vector<1x16xf32> to vector<8x16xf32>
    %27 = arith.addf %24, %26 : vector<8x16xf32>
    %28 = arith.addf %0, %22 : vector<8x16xf32>
    %29 = math.exp %27 : vector<8x16xf32>
    %c0_25 = arith.constant 0 : index
    %c0_26 = arith.constant 0 : index
    %30 = vector.load %arg3[%c0_25, %c0_26] : memref<8x16xf32, #tpu.memory_space<vmem>>, vector<8x16xf32>
    %31 = arith.mulf %29, %30 : vector<8x16xf32>
    %32 = arith.addf %28, %31 : vector<8x16xf32>
    %33 = tpu.iota {dimensions = array<i32: 1>} : vector<1x16xi32>
    %c8_i32 = arith.constant 8 : i32
    %34 = vector.broadcast %c8_i32 : i32 to vector<1x16xi32>
    %35 = arith.cmpi slt, %33, %34 : vector<1x16xi32>
    %cst_27 = arith.constant 1.000000e+00 : f32
    %cst_28 = arith.constant 1.000000e+00 : f32
    %36 = vector.broadcast %cst_27 : f32 to vector<1x16xf32>
    %37 = vector.broadcast %cst_28 : f32 to vector<1x16xf32>
    %38 = arith.select %35, %36, %37 : vector<1x16xi1>, vector<1x16xf32>
    %cst_29 = arith.constant 1.000000e-01 : f32
    %cst_30 = arith.constant 1.000000e+00 : f32
    %39 = vector.broadcast %cst_29 : f32 to vector<1x16xf32>
    %40 = vector.broadcast %cst_30 : f32 to vector<1x16xf32>
    %41 = arith.select %35, %39, %40 : vector<1x16xi1>, vector<1x16xf32>
    %c0_31 = arith.constant 0 : index
    %c0_32 = arith.constant 0 : index
    %42 = vector.load %arg4[%c0_31, %c0_32] : memref<8x16xf32, #tpu.memory_space<vmem>>, vector<8x16xf32>
    %43 = arith.subf %32, %42 : vector<8x16xf32>
    %44 = vector.broadcast %38 : vector<1x16xf32> to vector<8x16xf32>
    %45 = arith.mulf %43, %44 : vector<8x16xf32>
    %cst_33 = arith.constant 0.000000e+00 : f32
    %46 = vector.shape_cast %35 : vector<1x16xi1> to vector<1x16xi1>
    %47 = vector.broadcast %46 : vector<1x16xi1> to vector<8x16xi1>
    %48 = vector.broadcast %cst_33 : f32 to vector<8x16xf32>
    %49 = arith.select %47, %0, %48 : vector<8x16xi1>, vector<8x16xf32>
    %50 = arith.subf %32, %49 : vector<8x16xf32>
    %51 = vector.broadcast %41 : vector<1x16xf32> to vector<8x16xf32>
    %52 = arith.mulf %50, %51 : vector<8x16xf32>
    %53 = arith.mulf %45, %45 : vector<8x16xf32>
    %54 = arith.mulf %52, %52 : vector<8x16xf32>
    %55 = arith.addf %53, %54 : vector<8x16xf32>
    %cst_34 = arith.constant dense<0.000000e+00> : vector<8xf32>
    %56 = vector.multi_reduction <add>, %55, %cst_34 [1] : vector<8x16xf32> to vector<8xf32>
    %57 = vector.shape_cast %56 : vector<8xf32> to vector<8x1xf32>
    %58 = arith.mulf %2, %2 : vector<8x8xf32>
    %cst_35 = arith.constant dense<0.000000e+00> : vector<8xf32>
    %59 = vector.multi_reduction <add>, %58, %cst_35 [1] : vector<8x8xf32> to vector<8xf32>
    %60 = vector.shape_cast %59 : vector<8xf32> to vector<8x1xf32>
    %cst_36 = arith.constant 1.000000e+02 : f32
    %61 = vector.broadcast %cst_36 : f32 to vector<8x1xf32>
    %62 = arith.mulf %61, %60 : vector<8x1xf32>
    %63 = arith.addf %57, %62 : vector<8x1xf32>
    %cst_37 = arith.constant -5.000000e-01 : f32
    %64 = vector.broadcast %cst_37 : f32 to vector<8x1xf32>
    %65 = arith.mulf %64, %63 : vector<8x1xf32>
    %cst_38 = arith.constant -36.7575417 : f32
    %66 = vector.broadcast %cst_38 : f32 to vector<8x1xf32>
    %67 = arith.addf %65, %66 : vector<8x1xf32>
    %c0_39 = arith.constant 0 : index
    %c0_40 = arith.constant 0 : index
    %68 = vector.load %arg14[%c0_39, %c0_40] : memref<8x1xf32, #tpu.memory_space<vmem>>, vector<8x1xf32>
    tpu.vector_store %arg14[%c0_39, %c0_40], %67 {strides = array<i32>} : memref<8x1xf32, #tpu.memory_space<vmem>>, vector<8x1xf32>,
    return
  }
  func.func @transform_0(%arg0: i32) -> (i32, i32) {
    %c0_i32 = arith.constant 0 : i32
    %c0_i32_0 = arith.constant 0 : i32
    return %arg0, %c0_i32 : i32, i32
  }
  func.func @transform_1(%arg0: i32) -> (i32, i32) {
    %c0_i32 = arith.constant 0 : i32
    %c0_i32_0 = arith.constant 0 : i32
    return %arg0, %c0_i32 : i32, i32
  }
  func.func @transform_2(%arg0: i32) -> (i32, i32) {
    %c0_i32 = arith.constant 0 : i32
    %c0_i32_0 = arith.constant 0 : i32
    return %arg0, %c0_i32 : i32, i32
  }
  func.func @transform_3(%arg0: i32) -> (i32, i32) {
    %c0_i32 = arith.constant 0 : i32
    %c0_i32_0 = arith.constant 0 : i32
    %c0_i32_1 = arith.constant 0 : i32
    return %c0_i32, %c0_i32_0 : i32, i32
  }
  func.func @transform_4(%arg0: i32) -> (i32, i32) {
    %c0_i32 = arith.constant 0 : i32
    %c0_i32_0 = arith.constant 0 : i32
    %c0_i32_1 = arith.constant 0 : i32
    return %c0_i32, %c0_i32_0 : i32, i32
  }
  func.func @transform_5(%arg0: i32) -> (i32, i32) {
    %c0_i32 = arith.constant 0 : i32
    %c0_i32_0 = arith.constant 0 : i32
    %c0_i32_1 = arith.constant 0 : i32
    return %c0_i32, %c0_i32_0 : i32, i32
  }
  func.func @transform_6(%arg0: i32) -> (i32, i32) {
    %c0_i32 = arith.constant 0 : i32
    %c0_i32_0 = arith.constant 0 : i32
    %c0_i32_1 = arith.constant 0 : i32
    return %c0_i32, %c0_i32_0 : i32, i32
  }
  func.func @transform_7(%arg0: i32) -> (i32, i32) {
    %c0_i32 = arith.constant 0 : i32
    %c0_i32_0 = arith.constant 0 : i32
    %c0_i32_1 = arith.constant 0 : i32
    return %c0_i32, %c0_i32_0 : i32, i32
  }
  func.func @transform_8(%arg0: i32) -> (i32, i32) {
    %c0_i32 = arith.constant 0 : i32
    %c0_i32_0 = arith.constant 0 : i32
    %c0_i32_1 = arith.constant 0 : i32
    return %c0_i32, %c0_i32_0 : i32, i32
  }
  func.func @transform_9(%arg0: i32) -> (i32, i32) {
    %c0_i32 = arith.constant 0 : i32
    %c0_i32_0 = arith.constant 0 : i32
    %c0_i32_1 = arith.constant 0 : i32
    return %c0_i32, %c0_i32_0 : i32, i32
  }
  func.func @transform_10(%arg0: i32) -> (i32, i32) {
    %c0_i32 = arith.constant 0 : i32
    %c0_i32_0 = arith.constant 0 : i32
    %c0_i32_1 = arith.constant 0 : i32
    return %c0_i32, %c0_i32_0 : i32, i32
  }
  func.func @transform_11(%arg0: i32) -> (i32, i32) {
    %c0_i32 = arith.constant 0 : i32
    %c0_i32_0 = arith.constant 0 : i32
    %c0_i32_1 = arith.constant 0 : i32
    return %c0_i32, %c0_i32_0 : i32, i32
  }
  func.func @transform_12(%arg0: i32) -> (i32, i32) {
    %c0_i32 = arith.constant 0 : i32
    %c0_i32_0 = arith.constant 0 : i32
    %c0_i32_1 = arith.constant 0 : i32
    return %c0_i32, %c0_i32_0 : i32, i32
  }
  func.func @transform_13(%arg0: i32) -> (i32, i32) {
    %c0_i32 = arith.constant 0 : i32
    %c0_i32_0 = arith.constant 0 : i32
    return %arg0, %c0_i32 : i32, i32
  }
}

</mosaic_0001>

<bundles_post_ra>
// kernel: tpu_custom_call.1
= control target key start
LH: loop header
LB: loop body
LE: loop exit
PB: predicated region body
PF: predicated region fallthrough
CT: control target
= control target key end

     0   :  { %18 = vsyncpa [#allocation3], 0  ;;  %s874_s0 = inlined_call_operand.vmem [shape: f32[8,16], index: 0, kind: input, shape index: {}]   ;;  %s875_s1 = inlined_call_operand.vmem [shape: f32[8,8], index: 1, kind: input, shape index: {}]   ;;  %s876_s2 = inlined_call_operand.vmem [shape: f32[8,16], index: 2, kind: input, shape index: {}]   ;;  %s877_s3 = inlined_call_operand.vmem [shape: f32[8,16], index: 3, kind: input, shape index: {}]   ;;  %s878_s4 = inlined_call_operand.vmem [shape: f32[16,32], index: 4, kind: input, shape index: {}]   ;;  %s879_s5 = inlined_call_operand.hbm [shape: f32[8,32], index: 5, kind: input, shape index: {}]   ;;  %s880_s6 = inlined_call_operand.hbm [shape: f32[1,32], index: 6, kind: input, shape index: {}]   ;;  %s881_s7 = inlined_call_operand.vmem [shape: f32[32,32], index: 7, kind: input, shape index: {}]   ;;  %s882_s8 = inlined_call_operand.hbm [shape: f32[1,32], index: 8, kind: input, shape index: {}]   ;;  %s883_s9 = inlined_call_operand.vmem [shape: f32[32,16], index: 9, kind: input, shape index: {}]   ;;  %s884_s10 = inlined_call_operand.vmem [shape: f32[1,16], index: 10, kind: input, shape index: {}]   ;;  %s885_s11 = inlined_call_operand.vmem [shape: f32[32,16], index: 11, kind: input, shape index: {}]   ;;  %s886_s12 = inlined_call_operand.vmem [shape: f32[1,16], index: 12, kind: input, shape index: {}]   ;;  %s887_s13 = inlined_call_operand.vmem [shape: f32[8,1], index: 13, kind: output, shape index: {}]  }
   0x1   :  { %19 = vsyncpa [#allocation5], 0  ;;  %s684_s25 = smov [#allocation4]   ;;  %s685_s27 = smov [#allocation2]  }
   0x2   :  { %s46_s26 = sshll.u32 %s684_s25, 4  ;;  %s36_s28 = sshll.u32 %s685_s27, 4  ;;  %s47_s26 = int_to_ptr.vmem [resolvable:$true] %s46_s26  ;;  %s37_s28 = int_to_ptr.vmem [resolvable:$true] %s36_s28 }
   0x3   :  { %s628_s29 = scalar_lea.vmem %s47_s26, 16  ;;  %s632_s30 = scalar_lea.vmem %s47_s26, 32 }
   0x4   :  { %p629_p0 = scmp.ne.s32.totalorder %s47_s26, %s628_s29  ;;  %p633_p1 = scmp.lt.s32.totalorder %s47_s26, %s47_s26 }
   0x5   :  { %p634_p2 = scmp.lt.s32.totalorder %s632_s30, %s628_s29 }
   0x7   :  { %p635_p3 = por %p634_p2, %p633_p1 }
   0x9   :  { %p636_p4 = pnand %p635_p3, %p629_p0 }
   0xb   :  { %639 = shalt.err (!%p636_p4)
}
   0xc   :  { %49 = dma.hbm_to_vmem [thread:$0]  %s880_s6, 16, %s47_s26, [#allocation5]  }
   0xd   :  { %s648_s16 = scalar_lea.vmem %s37_s28, 128  ;;  %p653_p6 = scmp.lt.s32.totalorder %s37_s28, %s37_s28 }
   0xe   :  { %p649_p5 = scmp.ne.s32.totalorder %s37_s28, %s648_s16  ;;  %p654_p7 = scmp.lt.s32.totalorder %s648_s16, %s648_s16 }
  0x10   :  { %p655_p8 = por %p654_p7, %p653_p6 }
  0x12   :  { %p656_p9 = pnand %p655_p8, %p649_p5 }
  0x14   :  { %659 = shalt.err (!%p656_p9)
}
  0x15   :  { %39 = dma.hbm_to_vmem [thread:$0]  %s879_s5, 128, %s37_s28, [#allocation3]  }
  0x16   :  { %s686_s19 = smov [#allocation6]  }
  0x17   :  { %s58_s20 = sshll.u32 %s686_s19, 4  ;;  %s59_s20 = int_to_ptr.vmem [resolvable:$true] %s58_s20 }
  0x18   :  { %s668_s21 = scalar_lea.vmem %s59_s20, 16  ;;  %s672_s22 = scalar_lea.vmem %s59_s20, 32 }
  0x19   :  { %p669_p10 = scmp.ne.s32.totalorder %s59_s20, %s668_s21  ;;  %p673_p11 = scmp.lt.s32.totalorder %s59_s20, %s59_s20 }
  0x1a   :  { %p674_p12 = scmp.lt.s32.totalorder %s672_s22, %s668_s21 }
  0x1c   :  { %p675_p13 = por %p674_p12, %p673_p11 }
  0x1e   :  { %p676_p0 = pnand %p675_p13, %p669_p10 }
  0x20   :  { %679 = shalt.err (!%p676_p0)
}
  0x21   :  { %61 = dma.hbm_to_vmem [thread:$0]  %s882_s8, 16, %s59_s20, [#allocation5]  }
  0x22   :  { %680 = dma.done.wait [#allocation3], 128  }
  0x23   :  { %681 = vsyncadd [#allocation3], 4294967168 }
  0x24   :  { %682 = dma.done.wait [#allocation5], 32  }
  0x25   :  { %683 = vsyncadd [#allocation5], 4294967264  ;;  %v687_v0 = vmov 0.0   ;;  %vm688_vm0 = vmmov 0   ;;  %v84_v1 = vld [vmem:[#allocation2] sm:$0xff]  ;;  %vm85_vm1 = vcmask 64512   ;;  %v499_v41 = vlaneseq }
  0x26   :  { %561 = vmatprep.subr.mxu1 %v687_v0  ;;  %563 = vmatprep.mubr.msk.f32.mxu1 %vm688_vm0, %v687_v0  ;;  %v80_v2 = vld [vmem:[%s875_s1] sm:$0xff]  ;;  %v83_v3 = vld [vmem:[%s878_s4 + $0x8] sm:$0xff]  ;;  %vm159_vm2 = vcmask 130048   ;;  %v245_v7 = vld [vmem:[%s881_s7 + $0x18] sm:$0xff]  ;;  %vm253_vm3 = vcmask 261120   ;;  %v689_v52 = vmov 1.0  }
  0x27   :  { %573 = vmatprep.subr.mxu0 %v687_v0  ;;  %581 = vmatprep.mubr.msk.f32.mxu0 %vm688_vm0, %v687_v0  ;;  %612 = vtanh.f32 %v80_v2  ;;  %v82_v5 = vld [vmem:[%s878_s4] sm:$0xff]  ;;  %v244_v8 = vld [vmem:[%s881_s7 + $0x10] sm:$0xff]  ;;  %v243_v9 = vld [vmem:[%s881_s7 + $0x8] sm:$0xff]  ;;  %v500_v43 = vand.u32 127, %v499_v41  ;;  %vm524_vm5 = vcmask 7168  }
  0x28   :  { %562 = vmatpush3.msra.mxu1 %v84_v1  ;;  %v794_v6 = vld [vmem:[%s874_s0] sm:$0xff]  ;;  %574 = vmatpush3.msra.mxu0 %v245_v7  ;;  %v534_v14 = vld [vmem:[#allocation4] ss:$0 sm:$0xff]  ;;  %v331_v19 = vld [vmem:[%s883_s9 + $0x18] sm:$0xff] }
  0x29   :  { %566 = vmatprep.subr.mxu1 %v687_v0  ;;  %575 = vmatprep.subr.mxu0 %v687_v0  ;;  %v242_v10 = vld [vmem:[%s881_s7] sm:$0xff]  ;;  %v415_v20 = vld [vmem:[%s885_s11 + $0x18] sm:$0xff]  ;;  %v330_v21 = vld [vmem:[%s883_s9 + $0x10] sm:$0xff]  ;;  %vm501_vm4 = vcmp.lt.s32.totalorder %v500_v43, 8 }
  0x2a   :  { %576 = vmatpush3.msra.mxu0 %v244_v8  ;;  %v414_v22 = vld [vmem:[%s885_s11 + $0x10] sm:$0xff]  ;;  %v329_v23 = vld [vmem:[%s883_s9 + $0x8] sm:$0xff]  ;;  %v328_v25 = vld [vmem:[%s883_s9] sm:$0xff]  ;;  %v507_v50 = vsel %vm501_vm4, %v794_v6, 0.0  ;;  %v502_v53 = vsel %vm501_vm4, 0.1, %v689_v52 }
  0x2b   :  { %577 = vmatprep.subr.mxu0 %v687_v0  ;;  %v413_v24 = vld [vmem:[%s885_s11 + $0x8] sm:$0xff]  ;;  %v412_v26 = vld [vmem:[%s885_s11] sm:$0xff] }
  0x2c   :  { %578 = vmatpush3.msra.mxu0 %v243_v9  ;;  %v535_v27 = vld [vmem:[#allocation6] ss:$0 sm:$0xff]  ;;  %v539_v34 = vld [vmem:[%s886_s12] ss:$0 sm:$0xff] }
  0x2d   :  { %579 = vmatprep.subr.mxu0 %v687_v0  ;;  %v537_v42 = vld [vmem:[%s884_s10] ss:$0 sm:$0xff] }
  0x2e   :  { %580 = vmatpush3.msra.mxu0 %v242_v10  ;;  %v496_v45 = vld [vmem:[%s876_s2] sm:$0xff] }
  0x2f   :  { %595 = vmatprep.subr.mxu0 %v687_v0  ;;  %v503_v49 = vld [vmem:[%s877_s3] sm:$0xff] }
  0x34   :  { %v782_v4 = vpop.eup %612 }
  0x35   :  { %564 = vmatmul.mubr.msk.f32.vlgmr.msra.gmra.mxu1 %vm85_vm1, %v782_v4  ;;  %v516_v32 = vmul.f32 %v782_v4, %v782_v4 }
  0x36   :  { %567 = vmatpush3.msra.mxu1 %v83_v3  ;;  %570 = vmatprep.mubr.msk.f32.mxu1 %vm688_vm0, %v687_v0 }
  0x37   :  { %568 = vmatprep.subr.mxu1 %v687_v0  ;;  %v517_v33 = vsel %vm85_vm1, %v516_v32, 0.0 }
  0x38   :  { %569 = vmatpush3.msra.mxu1 %v82_v5  ;;  %518 = vadd.xlane.f32.xlu0 %v517_v33 }
  0x39   :  { %571 = vmatmul.mubr.msk.f32.vlgmr.msra.gmra.mxu1 %vm159_vm2, %v794_v6  ;;  %584 = vmatprep.subr.mxu1 %v687_v0 }
  0x3a   :  { %592 = vmatprep.mubr.msk.f32.mxu1 %vm688_vm0, %v687_v0  ;;  %585 = vmatpush3.msra.mxu1 %v331_v19 }
  0x3b   :  { %586 = vmatprep.subr.mxu1 %v687_v0 }
  0x3c   :  { %587 = vmatpush3.msra.mxu1 %v330_v21 }
  0x3d   :  { %588 = vmatprep.subr.mxu1 %v687_v0 }
  0x3e   :  { %589 = vmatpush3.msra.mxu1 %v329_v23 }
  0x3f   :  { %590 = vmatprep.subr.mxu1 %v687_v0 }
  0x40   :  { %591 = vmatpush3.msra.mxu1 %v328_v25 }
  0xc1   :  { %v519_v61 = vpop.xlane.xlu0 %518 }
  0xc2   :  { %v520_v62 = vmul.f32 100.0, %v519_v61 }
  0xf5   :  { %v155_v11 = vpop.f32.mrf.mxu1 }
  0xf7   :  { %v565_v12 = vpop.f32.mrf.mxu1 }
  0xf9   :  { %v229_v13 = vpop.f32.mrf.mxu1 }
  0xfa   :  { %v230_v15 = vadd.f32 %v229_v13, %v155_v11 }
  0xfb   :  { %v572_v16 = vpop.f32.mrf.mxu1 }
  0xfc   :  { %v240_v17 = vadd.f32 %v534_v14, %v230_v15 }
  0xfe   :  { %614 = vtanh.f32 %v240_v17 }
 0x10b   :  { %v615_v18 = vpop.eup %614 }
 0x10c   :  { %582 = vmatmul.mubr.msk.f32.vlgmr.msra.gmra.mxu0 %vm253_vm3, %v615_v18 }
 0x10d   :  { %603 = vmatprep.mubr.msk.f32.mxu0 %vm688_vm0, %v687_v0  ;;  %596 = vmatpush3.msra.mxu0 %v415_v20 }
 0x10e   :  { %597 = vmatprep.subr.mxu0 %v687_v0 }
 0x10f   :  { %598 = vmatpush3.msra.mxu0 %v414_v22 }
 0x110   :  { %599 = vmatprep.subr.mxu0 %v687_v0 }
 0x111   :  { %600 = vmatpush3.msra.mxu0 %v413_v24 }
 0x112   :  { %601 = vmatprep.subr.mxu0 %v687_v0 }
 0x113   :  { %602 = vmatpush3.msra.mxu0 %v412_v26 }
 0x1cc   :  { %v323_v28 = vpop.f32.mrf.mxu0 }
 0x1cd   :  { %v324_v29 = vadd.f32 %v535_v27, %v323_v28 }
 0x1ce   :  { %v583_v30 = vpop.f32.mrf.mxu0 }
 0x1cf   :  { %616 = vtanh.f32 %v324_v29 }
 0x1dc   :  { %v617_v31 = vpop.eup %616 }
 0x1dd   :  { %593 = vmatmul.mubr.msk.f32.vlgmr.msra.gmra.mxu1 %vm253_vm3, %v617_v31  ;;  %604 = vmatmul.mubr.msk.f32.vlgmr.msra.gmra.mxu0 %vm253_vm3, %v617_v31 }
 0x29d   :  { %v408_v35 = vpop.f32.mrf.mxu1  ;;  %v489_v36 = vpop.f32.mrf.mxu0 }
 0x29e   :  { %v490_v37 = vadd.f32 %v539_v34, %v489_v36  ;;  %v409_v44 = vadd.f32 %v537_v42, %v408_v35 }
 0x29f   :  { %v594_v38 = vpop.f32.mrf.mxu1  ;;  %v605_v39 = vpop.f32.mrf.mxu0 }
 0x2a0   :  { %v494_v40 = vmul.f32 1.442695, %v490_v37  ;;  %v493_v47 = vadd.f32 %v409_v44, %v794_v6 }
 0x2a2   :  { %618 = vpow2.f32 %v494_v40 }
 0x2af   :  { %v619_v46 = vpop.eup %618 }
 0x2b0   :  { %v497_v48 = vmul.f32 %v619_v46, %v496_v45 }
 0x2b2   :  { %v498_v51 = vadd.f32 %v497_v48, %v493_v47 }
 0x2b4   :  { %v504_v54 = vsub.f32 %v498_v51, %v503_v49  ;;  %v508_v55 = vsub.f32 %v498_v51, %v507_v50 }
 0x2b6   :  { %v509_v56 = vmul.f32 %v508_v55, %v502_v53  ;;  %v510_v57 = vmul.f32 %v504_v54, %v504_v54 }
 0x2b8   :  { %v511_v58 = vmul.f32 %v509_v56, %v509_v56 }
 0x2ba   :  { %v512_v59 = vadd.f32 %v511_v58, %v510_v57 }
 0x2bc   :  { %v513_v60 = vsel %vm159_vm2, %v512_v59, 0.0 }
 0x2bd   :  { %514 = vadd.xlane.f32.xlu0 %v513_v60 }
 0x346   :  { %v515_v63 = vpop.xlane.xlu0 %514 }
 0x347   :  { %v521_v0 = vadd.f32 %v520_v62, %v515_v63 }
 0x349   :  { %v522_v1 = vmul.f32 -0.5, %v521_v0 }
 0x34b   :  { %v523_v2 = vadd.f32 -36.75754, %v522_v1 }
 0x34d   :  { %525 = vst.msk [vmem:[%s887_s13] sm:$0xff] %vm524_vm5, %v523_v2 }
 0x34e   :  { %530 = vsyncpa [#allocation3], 1 }
 0x34f   :  { %531 = vsyncpa [#allocation5], 1 }

</bundles_post_ra>
